<compile_context>
chip_gen: v5e
topology: v5e:2x2
jax: 0.10.0
libtpu: 0.0.40
codegen_flags: <defaults>
</compile_context>

<pallas_src>
import functools

import jax
import jax.numpy as jnp
from jax import lax
from jax.experimental import pallas as pl
from jax.experimental.pallas import tpu as pltpu


def _ffn_kernel(x_ref, w1_ref, b1_ref, w2_ref, b2_ref, o_ref, acc_ref):
    # x_ref : (tm, E)   w1_ref : (tf, E)   b1_ref : (1, tf)
    # w2_ref: (E, tf)   b2_ref : (1, E)    o_ref  : (tm, E)
    # acc_ref: (tm, E) f32 scratch, accumulates fc2 over the F (reduction) axis
    f = pl.program_id(1)

    @pl.when(f == 0)
    def _init():
        acc_ref[...] = jnp.zeros_like(acc_ref)

    # fc1 slice: (tm, E) x (tf, E) -> (tm, tf), contracting the shared E axis.
    # Native-dtype MXU matmul with f32 accumulation (no weight up-cast).
    h = lax.dot_general(
        x_ref[...], w1_ref[...],
        dimension_numbers=(((1,), (1,)), ((), ())),
        preferred_element_type=jnp.float32)
    h = jnp.maximum(h + b1_ref[...].astype(jnp.float32), 0.0)  # relu

    # fc2 partial: (tm, tf) x (E, tf) -> (tm, E), accumulated over F tiles.
    acc_ref[...] += lax.dot_general(
        h.astype(w2_ref.dtype), w2_ref[...],
        dimension_numbers=(((1,), (1,)), ((), ())),
        preferred_element_type=jnp.float32)

    @pl.when(f == pl.num_programs(1) - 1)
    def _finalize():
        o_ref[...] = (acc_ref[...]
                      + b2_ref[...].astype(jnp.float32)).astype(o_ref.dtype)


def _round_up(x, m):
    return ((x + m - 1) // m) * m


@functools.partial(jax.jit, static_argnames=("tm", "tf"))
def ffn_forward(x, w1, b1, w2, b2, *, tm=None, tf=None):
    """x: (..., E). w1: (F, E), b1: (F,), w2: (E, F), b2: (E,) — PyTorch layout."""
    x_shape = x.shape
    E = x_shape[-1]
    F = w1.shape[0]

    x2 = x.reshape(-1, E)
    n_tok = x2.shape[0]
    x_bytes = jnp.dtype(x.dtype).itemsize
    w_bytes = jnp.dtype(w1.dtype).itemsize

    # ---- tile selection -----------------------------------------------------
    # Token tile: 256 rows fills the 256-wide MXU on v6e/v7x; small inputs use
    # a single tile rounded to the 8-sublane granule.
    if tm is None:
        tm = 256 if n_tok > 256 else _round_up(n_tok, 8)
    # FFN tile: keep double-buffered (tf,E)+(E,tf) weight tiles under ~32 MiB
    # so the whole pipeline fits v7x's 64 MiB per-TensorCore VMEM.
    if tf is None:
        tf_cap = (32 * 1024 * 1024) // (4 * E * w_bytes)
        tf_cap = max(128, (tf_cap // 128) * 128)
        tf_cap = min(tf_cap, 2048)
        tf = F if F <= tf_cap else tf_cap

    # ---- pad token / ffn dims so the grid divides evenly ---------------------
    pad_m = (-n_tok) % tm
    if pad_m:
        x2 = jnp.pad(x2, ((0, pad_m), (0, 0)))
    n_pad = x2.shape[0]

    pad_f = (-F) % tf
    if pad_f:
        # zero-padded FFN slices contribute relu(0 + 0) @ 0 == 0 -> exact.
        w1 = jnp.pad(w1, ((0, pad_f), (0, 0)))
        b1 = jnp.pad(b1, ((0, pad_f),))
        w2 = jnp.pad(w2, ((0, 0), (0, pad_f)))
    F_pad = F + pad_f

    b1_2d = b1.reshape(1, F_pad)
    b2_2d = b2.reshape(1, E)

    grid = (n_pad // tm, F_pad // tf)

    # ---- VMEM budget / scheduler hints ---------------------------------------
    vmem_est = (2 * tm * E * x_bytes            # x tile, double-buffered
                + 2 * tf * E * w_bytes          # W1 tile
                + 2 * E * tf * w_bytes          # W2 tile
                + 2 * (tf + E) * w_bytes        # biases
                + 2 * tm * E * x_bytes          # output tile
                + tm * E * 4)                   # f32 accumulator scratch
    vmem_limit = max(32 << 20, min(56 << 20, int(vmem_est * 1.25) + (4 << 20)))

    cost = pl.CostEstimate(
        flops=4 * n_tok * E * F,                # two matmuls, 2 flops/MAC
        transcendentals=0,
        bytes_accessed=(x2.size * x_bytes + w1.size * w_bytes + w2.size * w_bytes
                        + b1.size * w_bytes + b2.size * w_bytes
                        + n_pad * E * x_bytes))

    out = pl.pallas_call(
        _ffn_kernel,
        out_shape=jax.ShapeDtypeStruct((n_pad, E), x.dtype),
        grid=grid,
        in_specs=[
            pl.BlockSpec((tm, E), lambda i, f: (i, 0)),   # x tile (token-major)
            pl.BlockSpec((tf, E), lambda i, f: (f, 0)),   # W1 slice (native (F,E))
            pl.BlockSpec((1, tf), lambda i, f: (0, f)),   # b1 slice
            pl.BlockSpec((E, tf), lambda i, f: (0, f)),   # W2 slice (native (E,F))
            pl.BlockSpec((1, E), lambda i, f: (0, 0)),    # b2 (resident)
        ],
        out_specs=pl.BlockSpec((tm, E), lambda i, f: (i, 0)),
        scratch_shapes=[pltpu.VMEM((tm, E), jnp.float32)],
        compiler_params=pltpu.CompilerParams(
            dimension_semantics=("parallel", "arbitrary"),
            vmem_limit_bytes=vmem_limit),
        cost_estimate=cost,
    )(x2, w1, b1_2d, w2, b2_2d)

    if pad_m:
        out = out[:n_tok]
    return out.reshape(x_shape)


def _ref_ffn(x, w1, b1, w2, b2):
    x2 = x.reshape(-1, x.shape[-1]).astype(jnp.float32)
    h = jnp.maximum(x2 @ w1.T.astype(jnp.float32) + b1, 0.0)
    y = h @ w2.T.astype(jnp.float32) + b2
    return y.reshape(x.shape).astype(x.dtype)


if __name__ == "__main__":
    # TODO(synk): activation_dropout / dropout modules are no-ops here (eval mode, p=0).
    # small shapes consistent with the module: (seq, batch, embed_dim)
    seq, batch, embed_dim, ffn_dim = 8, 2, 32, 64

    key = jax.random.PRNGKey(0)
    kx, k1, k2, k3, k4 = jax.random.split(key, 5)

    x = jax.random.normal(kx, (seq, batch, embed_dim), dtype=jnp.float32)

    # deterministic parameter init (Linear-style uniform bounds), PyTorch layout
    bound1 = 1.0 / (embed_dim ** 0.5)
    bound2 = 1.0 / (ffn_dim ** 0.5)
    w1 = jax.random.uniform(k1, (ffn_dim, embed_dim), jnp.float32, -bound1, bound1)
    b1 = jax.random.uniform(k2, (ffn_dim,), jnp.float32, -bound1, bound1)
    w2 = jax.random.uniform(k3, (embed_dim, ffn_dim), jnp.float32, -bound2, bound2)
    b2 = jax.random.uniform(k4, (embed_dim,), jnp.float32, -bound2, bound2)

    out = ffn_forward(x, w1, b1, w2, b2)
    out = jax.block_until_ready(out)

    ref = _ref_ffn(x, w1, b1, w2, b2)
    assert out.shape == x.shape
    assert jnp.allclose(out, ref, atol=1e-4, rtol=1e-4), "mismatch vs reference"

    print("KERNEL_OK")
</pallas_src>

<mosaic_0001>
module attributes {stable_mosaic.version = 11 : i64} {
  func.func @_ffn_kernel(%arg0: i32, %arg1: i32, %arg2: memref<16x32xf32, #tpu.memory_space<vmem>>, %arg3: memref<64x32xf32, #tpu.memory_space<vmem>>, %arg4: memref<1x64xf32, #tpu.memory_space<vmem>>, %arg5: memref<32x64xf32, #tpu.memory_space<vmem>>, %arg6: memref<1x32xf32, #tpu.memory_space<vmem>>, %arg7: memref<16x32xf32, #tpu.memory_space<vmem>>, %arg8: memref<16x32xf32, #tpu.memory_space<vmem>>) attributes {dimension_semantics = [#tpu.dimension_semantics<parallel>, #tpu.dimension_semantics<arbitrary>], iteration_bounds = array<i64: 1, 1>, scalar_prefetch = 0 : i64, scratch_operands = 1 : i64, tpu.core_type = #tpu.core_type<tc>, window_params = [{transform_indices = @transform_0, window_bounds = array<i64: 16, 32>}, {transform_indices = @transform_1, window_bounds = array<i64: 64, 32>}, {transform_indices = @transform_2, window_bounds = array<i64: 1, 64>}, {transform_indices = @transform_3, window_bounds = array<i64: 32, 64>}, {pipeline_mode = #tpu.pipeline_mode<synchronous>, transform_indices = @transform_4, window_bounds = array<i64: 1, 32>}, {transform_indices = @transform_5, window_bounds = array<i64: 16, 32>}]} {
    %c0_i32 = arith.constant 0 : i32
    %0 = arith.cmpi eq, %arg1, %c0_i32 : i32
    %1 = arith.extui %0 : i1 to i32
    %c0_i32_0 = arith.constant 0 : i32
    %2 = arith.cmpi ne, %1, %c0_i32_0 : i32
    scf.if %2 {
      %cst_16 = arith.constant 0.000000e+00 : f32
      %19 = vector.broadcast %cst_16 : f32 to vector<16x32xf32>
      %c0_17 = arith.constant 0 : index
      %c0_18 = arith.constant 0 : index
      %20 = vector.load %arg8[%c0_17, %c0_18] : memref<16x32xf32, #tpu.memory_space<vmem>>, vector<16x32xf32>
      tpu.vector_store %arg8[%c0_17, %c0_18], %19 {strides = array<i32>} : memref<16x32xf32, #tpu.memory_space<vmem>>, vector<16x32xf32>,
    } else {
    }
    %c0 = arith.constant 0 : index
    %c0_1 = arith.constant 0 : index
    %3 = vector.load %arg2[%c0, %c0_1] : memref<16x32xf32, #tpu.memory_space<vmem>>, vector<16x32xf32>
    %c0_2 = arith.constant 0 : index
    %c0_3 = arith.constant 0 : index
    %4 = vector.load %arg3[%c0_2, %c0_3] : memref<64x32xf32, #tpu.memory_space<vmem>>, vector<64x32xf32>
    %cst = arith.constant dense<0.000000e+00> : vector<16x64xf32>
    %5 = tpu.matmul %3, %4, %cst {dimension_numbers = #tpu.dot_dimension_numbers<[1], [1], [0], [0], [0, 0, 1, 0], [], []>} : vector<16x32xf32>, vector<64x32xf32>, vector<16x64xf32> -> vector<16x64xf32>
    %c0_4 = arith.constant 0 : index
    %c0_5 = arith.constant 0 : index
    %6 = vector.load %arg4[%c0_4, %c0_5] : memref<1x64xf32, #tpu.memory_space<vmem>>, vector<1x64xf32>
    %7 = vector.broadcast %6 : vector<1x64xf32> to vector<16x64xf32>
    %8 = arith.addf %5, %7 : vector<16x64xf32>
    %cst_6 = arith.constant 0.000000e+00 : f32
    %9 = vector.broadcast %cst_6 : f32 to vector<16x64xf32>
    %10 = arith.maximumf %8, %9 : vector<16x64xf32>
    %c0_7 = arith.constant 0 : index
    %c0_8 = arith.constant 0 : index
    %11 = vector.load %arg8[%c0_7, %c0_8] : memref<16x32xf32, #tpu.memory_space<vmem>>, vector<16x32xf32>
    %c0_9 = arith.constant 0 : index
    %c0_10 = arith.constant 0 : index
    %12 = vector.load %arg5[%c0_9, %c0_10] : memref<32x64xf32, #tpu.memory_space<vmem>>, vector<32x64xf32>
    %cst_11 = arith.constant dense<0.000000e+00> : vector<16x32xf32>
    %13 = tpu.matmul %10, %12, %cst_11 {dimension_numbers = #tpu.dot_dimension_numbers<[1], [1], [0], [0], [0, 0, 1, 0], [], []>} : vector<16x64xf32>, vector<32x64xf32>, vector<16x32xf32> -> vector<16x32xf32>
    %14 = arith.addf %11, %13 : vector<16x32xf32>
    %c0_12 = arith.constant 0 : index
    %c0_13 = arith.constant 0 : index
    %15 = vector.load %arg8[%c0_12, %c0_13] : memref<16x32xf32, #tpu.memory_space<vmem>>, vector<16x32xf32>
    tpu.vector_store %arg8[%c0_12, %c0_13], %14 {strides = array<i32>} : memref<16x32xf32, #tpu.memory_space<vmem>>, vector<16x32xf32>,
    %c0_i32_14 = arith.constant 0 : i32
    %16 = arith.cmpi eq, %arg1, %c0_i32_14 : i32
    %17 = arith.extui %16 : i1 to i32
    %c0_i32_15 = arith.constant 0 : i32
    %18 = arith.cmpi ne, %17, %c0_i32_15 : i32
    scf.if %18 {
      %c0_16 = arith.constant 0 : index
      %c0_17 = arith.constant 0 : index
      %19 = vector.load %arg8[%c0_16, %c0_17] : memref<16x32xf32, #tpu.memory_space<vmem>>, vector<16x32xf32>
      %c0_18 = arith.constant 0 : index
      %c0_19 = arith.constant 0 : index
      %20 = vector.load %arg6[%c0_18, %c0_19] : memref<1x32xf32, #tpu.memory_space<vmem>>, vector<1x32xf32>
      %21 = vector.broadcast %20 : vector<1x32xf32> to vector<16x32xf32>
      %22 = arith.addf %19, %21 : vector<16x32xf32>
      %c0_20 = arith.constant 0 : index
      %c0_21 = arith.constant 0 : index
      %23 = vector.load %arg7[%c0_20, %c0_21] : memref<16x32xf32, #tpu.memory_space<vmem>>, vector<16x32xf32>
      tpu.vector_store %arg7[%c0_20, %c0_21], %22 {strides = array<i32>} : memref<16x32xf32, #tpu.memory_space<vmem>>, vector<16x32xf32>,
    } else {
    }
    return
  }
  func.func @transform_0(%arg0: i32, %arg1: i32) -> (i32, i32) {
    %c0_i32 = arith.constant 0 : i32
    %c0_i32_0 = arith.constant 0 : i32
    return %arg0, %c0_i32 : i32, i32
  }
  func.func @transform_1(%arg0: i32, %arg1: i32) -> (i32, i32) {
    %c0_i32 = arith.constant 0 : i32
    %c0_i32_0 = arith.constant 0 : i32
    return %arg1, %c0_i32 : i32, i32
  }
  func.func @transform_2(%arg0: i32, %arg1: i32) -> (i32, i32) {
    %c0_i32 = arith.constant 0 : i32
    %c0_i32_0 = arith.constant 0 : i32
    return %c0_i32, %arg1 : i32, i32
  }
  func.func @transform_3(%arg0: i32, %arg1: i32) -> (i32, i32) {
    %c0_i32 = arith.constant 0 : i32
    %c0_i32_0 = arith.constant 0 : i32
    return %c0_i32, %arg1 : i32, i32
  }
  func.func @transform_4(%arg0: i32, %arg1: i32) -> (i32, i32) {
    %c0_i32 = arith.constant 0 : i32
    %c0_i32_0 = arith.constant 0 : i32
    %c0_i32_1 = arith.constant 0 : i32
    return %c0_i32, %c0_i32_0 : i32, i32
  }
  func.func @transform_5(%arg0: i32, %arg1: i32) -> (i32, i32) {
    %c0_i32 = arith.constant 0 : i32
    %c0_i32_0 = arith.constant 0 : i32
    return %arg0, %c0_i32 : i32, i32
  }
}

</mosaic_0001>

<bundles_post_ra>
// kernel: ffn_forward.1
= control target key start
LH: loop header
LB: loop body
LE: loop exit
PB: predicated region body
PF: predicated region fallthrough
CT: control target
= control target key end

     0   :  { %vm25_vm0 = vcmask 261120   ;;  %vm104_vm1 = vcmask 523264   ;;  %s352_s0 = inlined_call_operand.vmem [shape: f32[16,32], index: 0, kind: input, shape index: {}]   ;;  %s353_s1 = inlined_call_operand.vmem [shape: f32[64,32], index: 1, kind: input, shape index: {}]   ;;  %s354_s2 = inlined_call_operand.vmem [shape: f32[1,64], index: 2, kind: input, shape index: {}]   ;;  %s355_s3 = inlined_call_operand.vmem [shape: f32[32,64], index: 3, kind: input, shape index: {}]   ;;  %s356_s4 = inlined_call_operand.vmem [shape: f32[1,32], index: 4, kind: input, shape index: {}]   ;;  %s357_s5 = inlined_call_operand.hbm [shape: f32[16,32], index: 5, kind: output, shape index: {}]  }
   0x1   :  { %v37_v0 = vld [vmem:[%s353_s1 + $0x38] sm:$0xff]  ;;  %v36_v1 = vld [vmem:[%s353_s1 + $0x30] sm:$0xff] }
   0x2   :  { %181 = vmatpush.xpose.msk.msra.mxu0 %vm25_vm0, %v37_v0  ;;  %197 = vmatpush.xpose.msk.msra.mxu2 %vm25_vm0, %v37_v0  ;;  %v103_v2 = vld [vmem:[%s355_s3 + $0x18] sm:$0xff]  ;;  %v102_v3 = vld [vmem:[%s355_s3 + $0x10] sm:$0xff] }
   0x3   :  { %191 = vmatpush.xpose.msk.msra.mxu1 %vm104_vm1, %v103_v2 }
   0x6   :  { %182 = vmatpush.xpose.msk.msra.mxu0 %vm25_vm0, %v36_v1  ;;  %198 = vmatpush.xpose.msk.msra.mxu2 %vm25_vm0, %v36_v1 }
   0x7   :  { %10 = vsyncpa [#allocation4], 0  ;;  %v35_v4 = vld [vmem:[%s353_s1 + $0x28] sm:$0xff]  ;;  %192 = vmatpush.xpose.msk.msra.mxu1 %vm104_vm1, %v102_v3  ;;  %v34_v6 = vld [vmem:[%s353_s1 + $0x20] sm:$0xff]  ;;  %v237_v14 = vmov 0.0   ;;  %s169_s25 = sshll.u32 %s357_s5, 4  ;;  %s170_s25 = int_to_ptr.hbm [resolvable:$true] %s169_s25 }
   0x8   :  { %v101_v5 = vld [vmem:[%s355_s3 + $0x8] sm:$0xff]  ;;  %v33_v7 = vld [vmem:[%s353_s1 + $0x18] sm:$0xff]  ;;  %v32_v8 = vld [vmem:[%s353_s1 + $0x10] sm:$0xff]  ;;  %26 = vst.msk [vmem:[#allocation2] sm:$0xff] %vm25_vm0, %v237_v14  ;;  %s240_s26 = smov 8  }
   0x9   :  { %v31_v9 = vld [vmem:[%s353_s1 + $0x8] sm:$0xff]  ;;  %v30_v10 = vld [vmem:[%s353_s1] sm:$0xff]  ;;  %27 = vst.msk [vmem:[#allocation2 + $0x8] sm:$0xff] %vm25_vm0, %v237_v14 }
   0xa   :  { %183 = vmatpush.xpose.msk.msra.mxu0 %vm25_vm0, %v35_v4  ;;  %199 = vmatpush.xpose.msk.msra.mxu2 %vm25_vm0, %v35_v4  ;;  %v28_v11 = vld [vmem:[%s352_s0] sm:$0xff]  ;;  %v29_v12 = vld [vmem:[%s352_s0 + $0x8] sm:$0xff] }
   0xb   :  { %193 = vmatpush.xpose.msk.msra.mxu1 %vm104_vm1, %v101_v5  ;;  %v100_v13 = vld [vmem:[%s355_s3] sm:$0xff] }
   0xc   :  { %v209_v15 = vld [vmem:[%s354_s2] ss:$0 sm:$0xff]  ;;  %s238_s2 = smov [#allocation3]  }
   0xd   :  { %v210_v26 = vld [vmem:[%s356_s4] ss:$0 sm:$0xff]  ;;  %s167_s22 = sshll.u32 %s238_s2, 4  ;;  %s239_s4 = smov 128   ;;  %s168_s22 = int_to_ptr.vmem [resolvable:$true] %s167_s22 }
   0xe   :  { %184 = vmatpush.xpose.msk.msra.mxu0 %vm25_vm0, %v34_v6  ;;  %200 = vmatpush.xpose.msk.msra.mxu2 %vm25_vm0, %v34_v6 }
   0xf   :  { %194 = vmatpush.xpose.msk.msra.mxu1 %vm104_vm1, %v100_v13  ;;  %v98_v22 = vld [vmem:[#allocation2] sm:$0xff] }
  0x10   :  { %v99_v25 = vld [vmem:[#allocation2 + $0x8] sm:$0xff] }
  0x12   :  { %185 = vmatpush.xpose.msk.msra.mxu0 %vm25_vm0, %v33_v7  ;;  %201 = vmatpush.xpose.msk.msra.mxu2 %vm25_vm0, %v33_v7 }
  0x16   :  { %186 = vmatpush.xpose.msk.msra.mxu0 %vm25_vm0, %v32_v8  ;;  %202 = vmatpush.xpose.msk.msra.mxu2 %vm25_vm0, %v32_v8 }
  0x1a   :  { %187 = vmatpush.xpose.msk.msra.mxu0 %vm25_vm0, %v31_v9  ;;  %203 = vmatpush.xpose.msk.msra.mxu2 %vm25_vm0, %v31_v9 }
  0x1e   :  { %188 = vmatpush.xpose.msk.msra.mxu0 %vm25_vm0, %v30_v10  ;;  %204 = vmatpush.xpose.msk.msra.mxu2 %vm25_vm0, %v30_v10 }
  0x21   :  { %189 = vmatmul.msk.f32.vlgmr.msra.gmra.mxu0 %vm25_vm0, %v28_v11  ;;  %190 = vmatmul.msk.f32.vlgmr.msra.gmra.mxu2 %vm25_vm0, %v29_v12 }
  0x9e   :  { %v90_v16 = vpop.f32.mrf.mxu0 }
  0x9f   :  { %v91_v17 = vadd.f32 %v209_v15, %v90_v16 }
  0xa1   :  { %v96_v18 = vmax.f32 %v91_v17, 0.0 }
  0xa3   :  { %195 = vmatmul.msk.f32.vlgmr.msra.gmra.mxu1 %vm104_vm1, %v96_v18 }
  0xa4   :  { %v93_v19 = vpop.f32.mrf.mxu2 }
  0xa5   :  { %v94_v20 = vadd.f32 %v209_v15, %v93_v19 }
  0xa7   :  { %v97_v21 = vmax.f32 %v94_v20, 0.0 }
  0xab   :  { %196 = vmatmul.msk.f32.gmra.mxu1 %vm104_vm1, %v97_v21 }
 0x120   :  { %v140_v23 = vpop.f32.mrf.mxu1 }
 0x121   :  { %v146_v24 = vadd.f32 %v140_v23, %v98_v22 }
 0x123   :  { %148 = vst.msk [vmem:[#allocation2] sm:$0xff] %vm25_vm0, %v146_v24 }
 0x128   :  { %v143_v27 = vpop.f32.mrf.mxu1 }
 0x129   :  { %v147_v28 = vadd.f32 %v143_v27, %v99_v25 }
 0x12a   :  { %v153_v29 = vld [vmem:[#allocation2] sm:$0xff] }
 0x12b   :  { %149 = vst.msk [vmem:[#allocation2 + $0x8] sm:$0xff] %vm25_vm0, %v147_v28  ;;  %v159_v30 = vadd.f32 %v210_v26, %v153_v29 }
 0x12d   :  { %161 = vst.msk [vmem:[#allocation3] sm:$0xff] %vm25_vm0, %v159_v30 }
 0x132   :  { %v154_v31 = vld [vmem:[#allocation2 + $0x8] sm:$0xff] }
 0x133   :  { %v160_v32 = vadd.f32 %v210_v26, %v154_v31 }
 0x135   :  { %162 = vst.msk [vmem:[#allocation3 + $0x8] sm:$0xff] %vm25_vm0, %v160_v32 }
 0x136   :  { %175 = dma.vmem_to_hbm [thread:$0]  %s168_s22, 256, %s170_s25, [#allocation4], %s239_s4, %s239_s4, %s240_s26  }
 0x137   :  { %235 = dma.done.wait [#allocation4], 256  }
 0x138   :  { %236 = vsyncadd [#allocation4], 4294967040 }
 0x139   :  { %180 = vsyncpa [#allocation4], 1 }

</bundles_post_ra>
